<compile_context>
chip_gen: v5e
topology: v5e:2x2
jax: 0.10.0
libtpu: 0.0.40
codegen_flags: <defaults>
</compile_context>

<pallas_src>
import functools

import jax
import jax.numpy as jnp
from jax import lax
from jax.experimental import pallas as pl
from jax.experimental.pallas import tpu as pltpu


def _round_up(x, m):
    return ((x + m - 1) // m) * m


def _test_module_kernel(x_ref, w_ref, y_ref, b_ref, loss_ref, pred_ref, *,
                        tile_b, n_valid, inv_n, need_mask):
    i = pl.program_id(0)

    @pl.when(i == 0)
    def _():
        loss_ref[...] = jnp.zeros_like(loss_ref)

    x = x_ref[...]                     # [D, TB] f32 (batch on lanes)
    w = w_ref[...]                     # [D, 1]  f32 (resident, broadcast over lanes)
    y = y_ref[...]                     # [1, TB] f32
    b = b_ref[0]                       # scalar bias from SMEM

    # Linear(10, 1): VPU multiply + sublane reduce; no MXU, no in-kernel transpose.
    z = jnp.sum(x * w, axis=0, keepdims=True) + b        # [1, TB] f32
    pred_ref[...] = z.astype(pred_ref.dtype)             # unmasked lane-dense store

    # BCEWithLogitsLoss, PyTorch's numerically stable form:
    #   l = max(z, 0) - z*y + log1p(exp(-|z|))   (exp/log run on the EUP slot)
    elem = jnp.maximum(z, 0.0) - z * y + jnp.log1p(jnp.exp(-jnp.abs(z)))

    if need_mask:
        # Zero padded batch lanes (only the final tile has any).
        col = i * tile_b + lax.broadcasted_iota(jnp.int32, elem.shape, 1)
        elem = jnp.where(col < n_valid, elem, 0.0)

    loss_ref[...] += jnp.sum(elem, axis=1, keepdims=True)

    @pl.when(i == pl.num_programs(0) - 1)
    def _():
        loss_ref[...] = loss_ref[...] * inv_n


def test_module_forward(float_features, weight, bias, label):
    """float_features: [B, D], weight: [1, D], bias: [1], label: [B, 1].

    Returns (loss: f32 scalar, pred: [B, 1] f32), matching TestModule.forward.
    """
    B, D = float_features.shape

    # Batch tile: lane-multiple, capped at 2048 columns (tiny VMEM footprint;
    # bigger tiles -> fewer grid steps -> less per-step overhead).
    TB = min(2048, _round_up(B, 128))
    Bp = _round_up(B, TB)
    pad = Bp - B

    xT = jnp.pad(float_features.astype(jnp.float32).T, ((0, 0), (0, pad)))      # [D, Bp]
    yT = jnp.pad(label.astype(jnp.float32).reshape(1, -1), ((0, 0), (0, pad)))  # [1, Bp]
    w_col = weight.astype(jnp.float32).reshape(-1, 1)                            # [D, 1]
    b_vec = bias.astype(jnp.float32).reshape(1)                                  # [1] -> SMEM

    kernel = functools.partial(
        _test_module_kernel,
        tile_b=TB, n_valid=B, inv_n=1.0 / B, need_mask=(pad > 0))

    cost = pl.CostEstimate(
        flops=int(2 * B * D + 8 * B),
        transcendentals=int(2 * B),
        bytes_accessed=int(4 * (D * Bp + D + 2 * Bp + 2)),
    )

    loss, pred_t = pl.pallas_call(
        kernel,
        grid=(Bp // TB,),
        in_specs=[
            pl.BlockSpec((D, TB), lambda i: (0, i)),            # x tile, batch on lanes
            pl.BlockSpec((D, 1), lambda i: (0, 0)),             # weight column (resident)
            pl.BlockSpec((1, TB), lambda i: (0, i)),            # label tile
            pl.BlockSpec(memory_space=pltpu.MemorySpace.SMEM),  # bias scalar
        ],
        out_specs=(
            pl.BlockSpec((1, 1), lambda i: (0, 0)),             # loss accumulator
            pl.BlockSpec((1, TB), lambda i: (0, i)),            # pred, lane-dense stores
        ),
        out_shape=(
            jax.ShapeDtypeStruct((1, 1), jnp.float32),
            jax.ShapeDtypeStruct((1, Bp), jnp.float32),
        ),
        compiler_params=pltpu.CompilerParams(
            dimension_semantics=("arbitrary",),   # loss accumulates across batch tiles
        ),
        cost_estimate=cost,
    )(xT, w_col, yT, b_vec)

    pred = pred_t[0, :B].reshape(B, 1)
    return loss[0, 0], pred


def _reference(float_features, weight, bias, label):
    z = float_features @ weight.T + bias.reshape(1, 1)
    l = jnp.mean(jnp.maximum(z, 0.0) - z * label + jnp.log1p(jnp.exp(-jnp.abs(z))))
    return l, z


if __name__ == "__main__":
    D = 10  # nn.Linear(10, 1): in_features=10, out_features=1

    key = jax.random.PRNGKey(0)
    kx, ky, kw, kb = jax.random.split(key, 4)

    # Deterministic parameter init mimicking nn.Linear default:
    # U(-1/sqrt(in_features), 1/sqrt(in_features))
    bound = 1.0 / jnp.sqrt(jnp.float32(D))
    weight = jax.random.uniform(kw, (1, D), jnp.float32, -bound, bound)
    bias = jax.random.uniform(kb, (1,), jnp.float32, -bound, bound)

    # B=8: single-tile path with masked padded tail; B=4500: multi-tile grid.
    for B in (8, 4500):
        kxb, kyb = jax.random.split(jax.random.fold_in(kx, B), 2)
        float_features = jax.random.normal(kxb, (B, D), dtype=jnp.float32)
        label = jax.random.bernoulli(kyb, 0.5, (B, 1)).astype(jnp.float32)

        loss, pred = test_module_forward(float_features, weight, bias, label)
        jax.block_until_ready((loss, pred))

        l_ref, z_ref = _reference(float_features, weight, bias, label)
        assert pred.shape == (B, 1)
        assert jnp.allclose(pred, z_ref, atol=1e-5), f"pred mismatch (B={B})"
        assert jnp.allclose(loss, l_ref, atol=1e-5), f"loss mismatch (B={B})"

    print("KERNEL_OK")
</pallas_src>

<mosaic_0001>
module attributes {stable_mosaic.version = 11 : i64} {
  func.func @_test_module_kernel(%arg0: i32, %arg1: memref<10x128xf32, #tpu.memory_space<vmem>>, %arg2: memref<10x1xf32, #tpu.memory_space<vmem>>, %arg3: memref<1x128xf32, #tpu.memory_space<vmem>>, %arg4: memref<1xf32, #tpu.memory_space<smem>>, %arg5: memref<1x1xf32, #tpu.memory_space<vmem>>, %arg6: memref<1x128xf32, #tpu.memory_space<vmem>>) attributes {dimension_semantics = [#tpu.dimension_semantics<arbitrary>], iteration_bounds = array<i64: 1>, scalar_prefetch = 0 : i64, scratch_operands = 0 : i64, tpu.core_type = #tpu.core_type<tc>, window_params = [{transform_indices = @transform_0, window_bounds = array<i64: 10, 128>}, {pipeline_mode = #tpu.pipeline_mode<synchronous>, transform_indices = @transform_1, window_bounds = array<i64: 10, 1>}, {transform_indices = @transform_2, window_bounds = array<i64: 1, 128>}, {transform_indices = @transform_3, window_bounds = array<i64: 1>}, {pipeline_mode = #tpu.pipeline_mode<synchronous>, transform_indices = @transform_4, window_bounds = array<i64: 1, 1>}, {transform_indices = @transform_5, window_bounds = array<i64: 1, 128>}]} {
    %c0_i32 = arith.constant 0 : i32
    %0 = arith.cmpi eq, %arg0, %c0_i32 : i32
    %1 = arith.extui %0 : i1 to i32
    %c0_i32_0 = arith.constant 0 : i32
    %2 = arith.cmpi ne, %1, %c0_i32_0 : i32
    scf.if %2 {
      %cst_19 = arith.constant 0.000000e+00 : f32
      %40 = vector.broadcast %cst_19 : f32 to vector<1x1xf32>
      %c0_20 = arith.constant 0 : index
      %c0_21 = arith.constant 0 : index
      %41 = vector.load %arg5[%c0_20, %c0_21] : memref<1x1xf32, #tpu.memory_space<vmem>>, vector<1x1xf32>
      tpu.vector_store %arg5[%c0_20, %c0_21], %40 {strides = array<i32>} : memref<1x1xf32, #tpu.memory_space<vmem>>, vector<1x1xf32>,
    } else {
    }
    %c0 = arith.constant 0 : index
    %c0_1 = arith.constant 0 : index
    %3 = vector.load %arg1[%c0, %c0_1] : memref<10x128xf32, #tpu.memory_space<vmem>>, vector<10x128xf32>
    %c0_2 = arith.constant 0 : index
    %c0_3 = arith.constant 0 : index
    %4 = vector.load %arg2[%c0_2, %c0_3] : memref<10x1xf32, #tpu.memory_space<vmem>>, vector<10x1xf32>
    %c0_4 = arith.constant 0 : index
    %c0_5 = arith.constant 0 : index
    %5 = vector.load %arg3[%c0_4, %c0_5] : memref<1x128xf32, #tpu.memory_space<vmem>>, vector<1x128xf32>
    %c0_6 = arith.constant 0 : index
    %6 = memref.load %arg4[%c0_6] : memref<1xf32, #tpu.memory_space<smem>>
    %7 = vector.broadcast %4 : vector<10x1xf32> to vector<10x128xf32>
    %8 = arith.mulf %3, %7 : vector<10x128xf32>
    %cst = arith.constant dense<0.000000e+00> : vector<128xf32>
    %9 = vector.multi_reduction <add>, %8, %cst [0] : vector<10x128xf32> to vector<128xf32>
    %10 = vector.shape_cast %9 : vector<128xf32> to vector<1x128xf32>
    %11 = vector.broadcast %6 : f32 to vector<1x128xf32>
    %12 = arith.addf %10, %11 : vector<1x128xf32>
    %c0_7 = arith.constant 0 : index
    %c0_8 = arith.constant 0 : index
    %13 = vector.load %arg6[%c0_7, %c0_8] : memref<1x128xf32, #tpu.memory_space<vmem>>, vector<1x128xf32>
    tpu.vector_store %arg6[%c0_7, %c0_8], %12 {strides = array<i32>} : memref<1x128xf32, #tpu.memory_space<vmem>>, vector<1x128xf32>,
    %cst_9 = arith.constant 0.000000e+00 : f32
    %14 = vector.broadcast %cst_9 : f32 to vector<1x128xf32>
    %15 = arith.maximumf %12, %14 : vector<1x128xf32>
    %16 = arith.mulf %12, %5 : vector<1x128xf32>
    %17 = arith.subf %15, %16 : vector<1x128xf32>
    %18 = math.absf %12 : vector<1x128xf32>
    %cst_10 = arith.constant 0.000000e+00 : f32
    %19 = vector.broadcast %cst_10 : f32 to vector<1x128xf32>
    %20 = arith.subf %19, %18 : vector<1x128xf32>
    %21 = math.exp %20 : vector<1x128xf32>
    %22 = math.log1p %21 : vector<1x128xf32>
    %23 = arith.addf %17, %22 : vector<1x128xf32>
    %c128_i32 = arith.constant 128 : i32
    %24 = arith.muli %arg0, %c128_i32 : i32
    %25 = tpu.iota {dimensions = array<i32: 1>} : vector<1x128xi32>
    %26 = vector.broadcast %24 : i32 to vector<1x128xi32>
    %27 = arith.addi %26, %25 : vector<1x128xi32>
    %c8_i32 = arith.constant 8 : i32
    %28 = vector.broadcast %c8_i32 : i32 to vector<1x128xi32>
    %29 = arith.cmpi slt, %27, %28 : vector<1x128xi32>
    %cst_11 = arith.constant 0.000000e+00 : f32
    %30 = vector.broadcast %cst_11 : f32 to vector<1x128xf32>
    %31 = arith.select %29, %23, %30 : vector<1x128xi1>, vector<1x128xf32>
    %c0_12 = arith.constant 0 : index
    %c0_13 = arith.constant 0 : index
    %32 = vector.load %arg5[%c0_12, %c0_13] : memref<1x1xf32, #tpu.memory_space<vmem>>, vector<1x1xf32>
    %cst_14 = arith.constant dense<0.000000e+00> : vector<1xf32>
    %33 = vector.multi_reduction <add>, %31, %cst_14 [1] : vector<1x128xf32> to vector<1xf32>
    %34 = vector.shape_cast %33 : vector<1xf32> to vector<1x1xf32>
    %35 = arith.addf %32, %34 : vector<1x1xf32>
    %c0_15 = arith.constant 0 : index
    %c0_16 = arith.constant 0 : index
    %36 = vector.load %arg5[%c0_15, %c0_16] : memref<1x1xf32, #tpu.memory_space<vmem>>, vector<1x1xf32>
    tpu.vector_store %arg5[%c0_15, %c0_16], %35 {strides = array<i32>} : memref<1x1xf32, #tpu.memory_space<vmem>>, vector<1x1xf32>,
    %c0_i32_17 = arith.constant 0 : i32
    %37 = arith.cmpi eq, %arg0, %c0_i32_17 : i32
    %38 = arith.extui %37 : i1 to i32
    %c0_i32_18 = arith.constant 0 : i32
    %39 = arith.cmpi ne, %38, %c0_i32_18 : i32
    scf.if %39 {
      %c0_19 = arith.constant 0 : index
      %c0_20 = arith.constant 0 : index
      %40 = vector.load %arg5[%c0_19, %c0_20] : memref<1x1xf32, #tpu.memory_space<vmem>>, vector<1x1xf32>
      %cst_21 = arith.constant 1.250000e-01 : f32
      %41 = vector.broadcast %cst_21 : f32 to vector<1x1xf32>
      %42 = arith.mulf %40, %41 : vector<1x1xf32>
      %c0_22 = arith.constant 0 : index
      %c0_23 = arith.constant 0 : index
      %43 = vector.load %arg5[%c0_22, %c0_23] : memref<1x1xf32, #tpu.memory_space<vmem>>, vector<1x1xf32>
      tpu.vector_store %arg5[%c0_22, %c0_23], %42 {strides = array<i32>} : memref<1x1xf32, #tpu.memory_space<vmem>>, vector<1x1xf32>,
    } else {
    }
    return
  }
  func.func @transform_0(%arg0: i32) -> (i32, i32) {
    %c0_i32 = arith.constant 0 : i32
    %c0_i32_0 = arith.constant 0 : i32
    return %c0_i32, %arg0 : i32, i32
  }
  func.func @transform_1(%arg0: i32) -> (i32, i32) {
    %c0_i32 = arith.constant 0 : i32
    %c0_i32_0 = arith.constant 0 : i32
    %c0_i32_1 = arith.constant 0 : i32
    return %c0_i32, %c0_i32_0 : i32, i32
  }
  func.func @transform_2(%arg0: i32) -> (i32, i32) {
    %c0_i32 = arith.constant 0 : i32
    %c0_i32_0 = arith.constant 0 : i32
    return %c0_i32, %arg0 : i32, i32
  }
  func.func @transform_3(%arg0: i32) -> i32 {
    %c0_i32 = arith.constant 0 : i32
    %c0_i32_0 = arith.constant 0 : i32
    return %c0_i32 : i32
  }
  func.func @transform_4(%arg0: i32) -> (i32, i32) {
    %c0_i32 = arith.constant 0 : i32
    %c0_i32_0 = arith.constant 0 : i32
    %c0_i32_1 = arith.constant 0 : i32
    return %c0_i32, %c0_i32_0 : i32, i32
  }
  func.func @transform_5(%arg0: i32) -> (i32, i32) {
    %c0_i32 = arith.constant 0 : i32
    %c0_i32_0 = arith.constant 0 : i32
    return %c0_i32, %arg0 : i32, i32
  }
}

</mosaic_0001>

<bundles_post_ra>
// kernel: tpu_custom_call.1
= control target key start
LH: loop header
LB: loop body
LE: loop exit
PB: predicated region body
PF: predicated region fallthrough
CT: control target
= control target key end

     0   :  { %12 = vsyncpa [#allocation4], 0  ;;  %v189_v1 = vmov 0   ;;  %s247_s0 = inlined_call_operand.vmem [shape: f32[10,128], index: 0, kind: input, shape index: {}]   ;;  %s248_s1 = inlined_call_operand.vmem [shape: f32[10,1], index: 1, kind: input, shape index: {}]   ;;  %s249_s2 = inlined_call_operand.vmem [shape: f32[1,128], index: 2, kind: input, shape index: {}]   ;;  %s250_s3 = inlined_call_operand.<no memory space> [shape: f32[1], index: 3, kind: input, shape index: {}]   ;;  %s251_s4 = inlined_call_operand.hbm [shape: f32[1,1], index: 4, kind: output, shape index: {0}]   ;;  %s252_s5 = inlined_call_operand.hbm [shape: f32[1,128], index: 5, kind: output, shape index: {1}]  }
   0x1   :  { %v31_v0 = vld [vmem:[%s248_s1 + $0x8] sm:$0x3]  ;;  %132 = vset.pattern.permute.xlu0 %v189_v1 }
   0x2   :  { %13 = vsyncpa [#allocation6], 0  ;;  %41 = vperm.xlu0 %132, %v31_v0   ;;  %v30_v2 = vld [vmem:[%s248_s1] sm:$0xff]  ;;  %v29_v4 = vld [vmem:[%s247_s0 + $0x8] sm:$0x3]  ;;  %vm46_vm0 = vcmask 1041408   ;;  %v55_v16 = vstv %s250_s3  ;;  %v76_v26 = vlaneseq }
   0x3   :  { %v28_v6 = vld [vmem:[%s247_s0] sm:$0xff]  ;;  %vm83_vm3 = vcmask 1040384   ;;  %s190_s3 = smov [#allocation5]   ;;  %s114_s30 = sshll.u32 %s252_s5, 4  ;;  %vm26_vm4 = vcmask 0   ;;  %v191_v40 = vmov 0.0   ;;  %s115_s30 = int_to_ptr.hbm [resolvable:$true] %s114_s30 }
   0x4   :  { %v32_v25 = vld [vmem:[%s249_s2] sm:$0x1]  ;;  %v77_v31 = vand.u32 127, %v76_v26  ;;  %s112_s2 = sshll.u32 %s190_s3, 4  ;;  %27 = vst.msk [vmem:[#allocation3] sm:$0x1] %vm26_vm4, %v191_v40  ;;  %s113_s2 = int_to_ptr.vmem [resolvable:$true] %s112_s2 }
   0x5   :  { %s192_s6 = smov [#allocation3]   ;;  %s103_s10 = sshll.u32 %s251_s4, 4  ;;  %s104_s10 = int_to_ptr.hbm [resolvable:$true] %s103_s10 }
   0x6   :  { %vm80_vm2 = vcmp.lt.s32.totalorder %v77_v31, 8  ;;  %s101_s7 = sshll.u32 %s192_s6, 4  ;;  %s102_s7 = int_to_ptr.vmem [resolvable:$true] %s101_s7 }
   0xa   :  { %36 = vperm.xlu0 %132, %v30_v2  }
   0xb   :  { %v82_v41 = vld [vmem:[#allocation3] sm:$0x1] }
  0x74   :  { %v42_v3 = vpop.permute.xlu0 %41 }
  0x75   :  { %v45_v5 = vmul.f32 %v42_v3, %v29_v4 }
  0x77   :  { %v47_v9 = vsel %vm46_vm0, %v45_v5, 0.0 }
  0x7c   :  { %v37_v7 = vpop.permute.xlu0 %36 }
  0x7d   :  { %v44_v8 = vmul.f32 %v37_v7, %v28_v6 }
  0x7f   :  { %v48_v10 = vadd.f32 %v47_v9, %v44_v8 }
  0x81   :  { %v49_v11 = vrot.slane %v48_v10, 4 }
  0x83   :  { %v50_v12 = vadd.f32 %v49_v11, %v48_v10 }
  0x85   :  { %v51_v13 = vrot.slane %v50_v12, 2 }
  0x87   :  { %v52_v14 = vadd.f32 %v51_v13, %v50_v12 }
  0x89   :  { %v53_v15 = vrot.slane %v52_v14, 1 }
  0x8b   :  { %v54_v17 = vadd.f32 %v53_v15, %v52_v14 }
  0x8d   :  { %v56_v18 = vadd.f32 %v55_v16, %v54_v17 }
  0x8f   :  { %v61_v19 = vand.u32 2147483647, %v56_v18  ;;  %57 = vst [vmem:[#allocation5] sm:$0x1] %v56_v18  ;;  %v58_v28 = vmax.f32 %v56_v18, 0.0  ;;  %v59_v29 = vmul.f32 %v56_v18, %v32_v25 }
  0x90   :  { %117 = dma.vmem_to_hbm [thread:$0]  %s113_s2, 16, %s115_s30, [#allocation6]  }
  0x91   :  { %v62_v20 = vsub.f32 0.0, %v61_v19  ;;  %v60_v35 = vsub.f32 %v58_v28, %v59_v29 }
  0x93   :  { %v63_v21 = vmul.f32 1.442695, %v62_v20 }
  0x95   :  { %133 = vpow2.f32 %v63_v21 }
  0x9b   :  { %v134_v22 = vpop.eup %133 }
  0x9c   :  { %v65_v23 = vadd.f32 1.0, %v134_v22  ;;  %v68_v24 = vmul.f32 -0.5, %v134_v22  ;;  %v71_v30 = vand.u32 2147483647, %v134_v22 }
  0x9e   :  { %135 = vlog2.f32 %v65_v23  ;;  %v69_v27 = vadd.f32 1.0, %v68_v24  ;;  %vm72_vm1 = vcmp.lt.f32.partialorder %v71_v30, 0.0004427343 }
  0xa0   :  { %v70_v34 = vmul.f32 %v134_v22, %v69_v27 }
  0xa4   :  { %v136_v32 = vpop.eup %135 }
  0xa5   :  { %v67_v33 = vmul.f32 0.6931472, %v136_v32 }
  0xa7   :  { %v73_v36 = vsel %vm72_vm1, %v70_v34, %v67_v33 }
  0xa8   :  { %v74_v37 = vadd.f32 %v73_v36, %v60_v35 }
  0xaa   :  { %v81_v38 = vsel %vm80_vm2, %v74_v37, 0.0 }
  0xab   :  { %v84_v39 = vsel %vm83_vm3, %v81_v38, 0.0 }
  0xac   :  { %85 = vadd.xlane.f32.xlu1 %v84_v39 }
 0x11f   :  { %v86_v42 = vpop.xlane.xlu1 %85 }
 0x120   :  { %v87_v43 = vadd.f32 %v86_v42, %v82_v41 }
 0x122   :  { %89 = vst.msk [vmem:[#allocation3] sm:$0x1] %vm26_vm4, %v87_v43 }
 0x129   :  { %v93_v44 = vld [vmem:[#allocation3] sm:$0x1] }
 0x12a   :  { %v94_v45 = vmul.f32 0.125, %v93_v44 }
 0x12c   :  { %95 = vst.msk [vmem:[#allocation3] sm:$0x1] %vm26_vm4, %v94_v45 }
 0x12d   :  { %106 = dma.vmem_to_hbm [thread:$0]  %s102_s7, 16, %s104_s10, [#allocation4]  }
 0x12e   :  { %185 = dma.done.wait [#allocation4], 16  }
 0x12f   :  { %186 = vsyncadd [#allocation4], 4294967280 }
 0x130   :  { %187 = dma.done.wait [#allocation6], 16  }
 0x131   :  { %188 = vsyncadd [#allocation6], 4294967280 }
 0x132   :  { %126 = vsyncpa [#allocation4], 1 }
 0x133   :  { %127 = vsyncpa [#allocation6], 1 }

</bundles_post_ra>
